<compile_context>
chip_gen: v5e
topology: v5e:2x2
jax: 0.10.0
libtpu: 0.0.40
codegen_flags: <defaults>
</compile_context>

<pallas_src>
import functools

import jax
import jax.numpy as jnp
from jax.experimental import pallas as pl
from jax.experimental.pallas import tpu as pltpu

_SUB = 512          # lanes per inner slice (multiple of 128)
_LANE_CAP = 16384   # max lanes per grid step


def _round_up(x, m):
    return ((x + m - 1) // m) * m


def _cdiv(a, b):
    return -(-a // b)


def _slice_plan(lane_block, sub=_SUB):
    plan, start = [], 0
    while start < lane_block:
        width = min(sub, lane_block - start)
        plan.append((start, width))
        start += width
    return plan


def _fold_lanes(x, width):
    """Fold x:(8, width) into (8, 128) partial sums with VPU adds only."""
    acc = x[:, 0:128]
    for c in range(1, width // 128):
        acc = acc + x[:, c * 128:(c + 1) * 128]
    return acc


def _sal_loss_kernel(p_ref, t_ref, f_ref, out_ref, acc_ref, *,
                     rows, L, row_block, lane_block, lane_ragged):
    ri = pl.program_id(0)            # row-block index ("parallel")
    li = pl.program_id(1)            # lane-block index ("arbitrary", reduction)
    num_l = pl.num_programs(1)
    lane0 = li * lane_block          # global lane offset of this lane block

    plan = _slice_plan(lane_block)
    num_rg = row_block // 8          # row groups of 8 sublanes

    # Fresh per-row moment accumulators for a new row block.
    @pl.when(li == 0)
    def _():
        acc_ref[...] = jnp.zeros((row_block, 8 * 128), jnp.float32)

    # ---- one-pass raw moments, folded to 128 lanes per moment (VPU only) ----
    def rg_body(rg, carry):
        r0 = pl.multiple_of(rg * 8, 8)
        rs = pl.ds(r0, 8)
        parts = None
        for start, width in plan:
            cs = pl.ds(start, width)
            p = p_ref[rs, cs].astype(jnp.float32)
            t = t_ref[rs, cs].astype(jnp.float32)
            fm = f_ref[rs, cs]
            fb = fm if fm.dtype == jnp.bool_ else (fm != 0)
            if lane_ragged:
                # Ragged lane tail: select-based masking of OOB lanes.
                lim = L - (lane0 + start)
                idx = jax.lax.broadcasted_iota(jnp.int32, (1, width), 1)
                ok = idx < lim
                p = jnp.where(ok, p, 0.0)
                t = jnp.where(ok, t, 0.0)
                fb = jnp.logical_and(fb, ok)
            f = fb.astype(jnp.float32)
            tlt = jnp.where(t > 0.0, t * jnp.log(t), 0.0)   # xlogy(t, t)
            terms = (p, t, p * p, t * t, p * t, tlt, f, p * f)
            folded = [_fold_lanes(x, width) for x in terms]
            parts = folded if parts is None else [a + b for a, b in zip(parts, folded)]
        # One full-width (unmasked) RMW per moment per row group per lane block.
        for m in range(8):
            ms = pl.ds(m * 128, 128)
            acc_ref[rs, ms] = acc_ref[rs, ms] + parts[m]
        return carry

    jax.lax.fori_loop(0, num_rg, rg_body, 0)

    # ---- finalize this row block once all lane chunks are accumulated ----
    @pl.when(li == num_l - 1)
    def _():
        def red(m):
            return jnp.sum(acc_ref[:, m * 128:(m + 1) * 128],
                           axis=-1, keepdims=True)            # (row_block, 1)
        S_p, S_t, S_pp, S_tt, S_pt, S_tlt, S_f, S_pf = [red(m) for m in range(8)]

        inv_L = jnp.float32(1.0 / L)
        inv_nm1 = (jnp.float32(1.0 / (L - 1)) if L > 1
                   else jnp.float32(float("nan")))            # matches ddof=1 NaN
        tiny = jnp.float32(1e-30)

        # Validity mask: ragged (out-of-range) rows must not contribute.
        gid = ri * row_block + jax.lax.broadcasted_iota(
            jnp.int32, (row_block, 1), 0)
        valid = gid < rows

        # nn.KLDivLoss(reduction='mean'): elementwise xlogy(t,t) - t*p.
        kl_rows = S_tlt - S_pt

        # MyCorrCoef: -cov(p,t)/sqrt(var(p)*var(t)) per row.
        cxy = S_pt - S_p * S_t * inv_L
        cxx = jnp.maximum(S_pp - S_p * S_p * inv_L, 0.0)
        cyy = jnp.maximum(S_tt - S_t * S_t * inv_L, 0.0)
        # TODO(synk): a Chan/Welford chunk merge would further reduce raw-moment
        # cancellation for near-constant rows; the clamps only prevent
        # rounding-induced negative variances / NaN from rsqrt.
        cc_rows = -cxy * jax.lax.rsqrt(jnp.maximum(cxx * cyy, tiny))

        # NSS: masked mean of (p - mean)/std (unbiased); 1.0 if no fixations.
        inv_std = jax.lax.rsqrt(jnp.maximum(cxx * inv_nm1, tiny))
        nss_rows = jnp.where(
            S_f > 0.0,
            -(inv_std * (S_pf - S_p * inv_L * S_f)) / S_f,
            jnp.float32(1.0))

        kl_sum = jnp.sum(jnp.where(valid, kl_rows, 0.0), keepdims=True)
        cc_sum = jnp.sum(jnp.where(valid, cc_rows, 0.0), keepdims=True)
        nss_sum = jnp.sum(jnp.where(valid, nss_rows, 0.0), keepdims=True)

        contrib = (5.0 * kl_sum * jnp.float32(1.0 / (rows * L))
                   + (cc_sum + nss_sum) * jnp.float32(1.0 / rows))   # (1, 1)
        out_ref[...] = contrib.reshape(1, 1, 1)


def sal_mse_loss(output, target_map, target_fix):
    """output, target_map: (B, C, H, W) float; target_fix: (B, C, H, W) bool/0-1."""
    B, C, H, W = output.shape
    rows = B * C
    L = H * W

    p = output.reshape(rows, L)
    t = target_map.reshape(rows, L)
    f = target_fix.reshape(rows, L)           # passed through, no dtype copy
    if p.dtype not in (jnp.float32, jnp.bfloat16):
        p = p.astype(jnp.float32)
    if t.dtype not in (jnp.float32, jnp.bfloat16):
        t = t.astype(jnp.float32)
    if f.dtype not in (jnp.bool_, jnp.int8, jnp.uint8, jnp.int32, jnp.uint32,
                       jnp.float32, jnp.bfloat16, jnp.float16):
        f = (f != 0)                          # exotic dtypes only

    # ---- generation-aware VMEM budget ----
    try:
        vmem_cap = pltpu.get_tpu_info().vmem_capacity_bytes
    except Exception:
        vmem_cap = 64 * 1024 * 1024           # conservative (v7x-sized)
    if vmem_cap >= 96 * 1024 * 1024:          # v5e / v6e: 128 MiB VMEM
        input_budget = 56 * 1024 * 1024
        vmem_limit = 96 * 1024 * 1024
    else:                                     # v7x: 64 MiB per TensorCore
        input_budget = 26 * 1024 * 1024
        vmem_limit = 48 * 1024 * 1024

    # ---- lane (spatial) blocking: multiple of 128, independent of L's factors ----
    lane_block = min(_round_up(L, 128), _LANE_CAP)
    num_lane_blocks = _cdiv(L, lane_block)
    lane_ragged = (L % lane_block) != 0

    # ---- row (sublane) blocking: multiple of 32 (1-byte mask tiles), ragged OK ----
    bytes_per_row = lane_block * (p.dtype.itemsize + t.dtype.itemsize
                                  + f.dtype.itemsize)
    rb_cap = input_budget // (2 * bytes_per_row)          # double-buffered inputs
    row_block = max(32, min(256, (rb_cap // 32) * 32))
    row_block = min(row_block, _round_up(rows, 32))
    if rows > 32:
        # Keep >= 2 row blocks so the "parallel" axis can feed both v7x cores.
        row_block = min(row_block, _round_up(_cdiv(rows, 2), 32))
    row_block = max(row_block, 32)
    num_row_blocks = _cdiv(rows, row_block)

    kernel = functools.partial(_sal_loss_kernel, rows=rows, L=L,
                               row_block=row_block, lane_block=lane_block,
                               lane_ragged=lane_ragged)
    partials = pl.pallas_call(
        kernel,
        out_shape=jax.ShapeDtypeStruct((num_row_blocks, 1, 1), jnp.float32),
        grid_spec=pltpu.PrefetchScalarGridSpec(
            num_scalar_prefetch=0,
            grid=(num_row_blocks, num_lane_blocks),
            in_specs=[
                pl.BlockSpec((row_block, lane_block), lambda i, j: (i, j)),
                pl.BlockSpec((row_block, lane_block), lambda i, j: (i, j)),
                pl.BlockSpec((row_block, lane_block), lambda i, j: (i, j)),
            ],
            out_specs=pl.BlockSpec((1, 1, 1), lambda i, j: (i, 0, 0)),
            scratch_shapes=[pltpu.VMEM((row_block, 8 * 128), jnp.float32)],
        ),
        compiler_params=pltpu.CompilerParams(
            dimension_semantics=("parallel", "arbitrary"),
            vmem_limit_bytes=vmem_limit,
        ),
    )(p, t, f)
    # Partials are already normalized; the total loss is their sum.
    return jnp.sum(partials)


def _ref_loss(output, target_map, target_fix):
    # Pure-JAX reference mirroring the PyTorch module, for a silent sanity check.
    B, C, H, W = output.shape
    rows, L = B * C, H * W
    p = output.reshape(rows, L).astype(jnp.float32)
    t = target_map.reshape(rows, L).astype(jnp.float32)
    f = target_fix.reshape(rows, L).astype(jnp.float32)

    kl = jnp.mean(jnp.where(t > 0.0, t * (jnp.log(t) - p), 0.0))

    xm = p - p.mean(-1, keepdims=True)
    ym = t - t.mean(-1, keepdims=True)
    r = -(xm * ym).mean(-1) / jnp.sqrt((xm * xm).mean(-1) * (ym * ym).mean(-1))
    cc = r.mean()

    std = jnp.std(p, axis=-1, ddof=1, keepdims=True)
    pn = xm / std
    msum = f.sum(-1)
    nss = jnp.where(msum > 0.0, -(pn * f).sum(-1) / msum, 1.0).mean()

    return 5.0 * kl + cc + nss


if __name__ == "__main__":
    key = jax.random.PRNGKey(0)
    k1, k2, k3 = jax.random.split(key, 3)

    B, C, H, W = 2, 4, 16, 16
    output = jax.random.normal(k1, (B, C, H, W), dtype=jnp.float32)
    # Positive saliency target map (log well-defined).
    target_map = jax.random.uniform(k2, (B, C, H, W), dtype=jnp.float32,
                                    minval=0.05, maxval=1.0)
    # Sparse binary fixation map (bool, passed straight into the kernel).
    target_fix = jax.random.uniform(k3, (B, C, H, W)) > 0.7

    loss = sal_mse_loss(output, target_map, target_fix)
    loss = jax.block_until_ready(loss)

    ref = jax.block_until_ready(_ref_loss(output, target_map, target_fix))
    assert jnp.allclose(loss, ref, rtol=1e-4, atol=1e-5), (loss, ref)

    print("KERNEL_OK")
</pallas_src>

<mosaic_0001>
module attributes {stable_mosaic.version = 11 : i64} {
  func.func @_sal_loss_kernel(%arg0: i32, %arg1: i32, %arg2: memref<32x256xf32, #tpu.memory_space<vmem>>, %arg3: memref<32x256xf32, #tpu.memory_space<vmem>>, %arg4: memref<32x256xi32, #tpu.memory_space<vmem>>, %arg5: memref<1x1x1xf32, #tpu.memory_space<vmem>>, %arg6: memref<32x1024xf32, #tpu.memory_space<vmem>>) attributes {dimension_semantics = [#tpu.dimension_semantics<parallel>, #tpu.dimension_semantics<arbitrary>], iteration_bounds = array<i64: 1, 1>, scalar_prefetch = 0 : i64, scratch_operands = 1 : i64, tpu.core_type = #tpu.core_type<tc>, window_params = [{transform_indices = @transform_0, window_bounds = array<i64: 32, 256>}, {transform_indices = @transform_1, window_bounds = array<i64: 32, 256>}, {transform_indices = @transform_2, window_bounds = array<i64: 32, 256>}, {transform_indices = @transform_3, window_bounds = array<i64: 1, 1, 1>}]} {
    %c0_i32 = arith.constant 0 : i32
    %0 = arith.cmpi eq, %arg1, %c0_i32 : i32
    %1 = arith.extui %0 : i1 to i32
    %c0_i32_0 = arith.constant 0 : i32
    %2 = arith.cmpi ne, %1, %c0_i32_0 : i32
    scf.if %2 {
      %cst = arith.constant 0.000000e+00 : f32
      %7 = vector.broadcast %cst : f32 to vector<32x1024xf32>
      %c0 = arith.constant 0 : index
      %c0_5 = arith.constant 0 : index
      %8 = vector.load %arg6[%c0, %c0_5] : memref<32x1024xf32, #tpu.memory_space<vmem>>, vector<32x1024xf32>
      tpu.vector_store %arg6[%c0, %c0_5], %7 {strides = array<i32>} : memref<32x1024xf32, #tpu.memory_space<vmem>>, vector<32x1024xf32>,
    } else {
    }
    %c0_i32_1 = arith.constant 0 : i32
    %c4_i32 = arith.constant 4 : i32
    %3 = arith.addi %c0_i32_1, %c4_i32 : i32
    %c1_i32 = arith.constant 1 : i32
    scf.for %arg7 = %c0_i32_1 to %3 step %c1_i32  : i32 {
      %c8_i32 = arith.constant 8 : i32
      %7 = arith.muli %arg7, %c8_i32 : i32
      %8 = tpu.assume_multiple %7, 8 : i32
      %9 = arith.index_cast %8 : i32 to index
      %c0 = arith.constant 0 : index
      %10 = vector.load %arg2[%9, %c0] : memref<32x256xf32, #tpu.memory_space<vmem>>, vector<8x256xf32>
      %11 = arith.index_cast %8 : i32 to index
      %c0_5 = arith.constant 0 : index
      %12 = vector.load %arg3[%11, %c0_5] : memref<32x256xf32, #tpu.memory_space<vmem>>, vector<8x256xf32>
      %13 = arith.index_cast %8 : i32 to index
      %c0_6 = arith.constant 0 : index
      %14 = vector.load %arg4[%13, %c0_6] : memref<32x256xi32, #tpu.memory_space<vmem>>, vector<8x256xi32>
      %cst = arith.constant dense<0> : vector<8x256xi32>
      %15 = arith.cmpi ne, %14, %cst : vector<8x256xi32>
      %16 = arith.extui %15 : vector<8x256xi1> to vector<8x256xi32>
      %17 = arith.sitofp %16 : vector<8x256xi32> to vector<8x256xf32>
      %cst_7 = arith.constant 0.000000e+00 : f32
      %18 = vector.broadcast %cst_7 : f32 to vector<8x256xf32>
      %19 = arith.cmpf ogt, %12, %18 : vector<8x256xf32>
      %20 = math.log %12 : vector<8x256xf32>
      %21 = arith.mulf %12, %20 : vector<8x256xf32>
      %cst_8 = arith.constant 0.000000e+00 : f32
      %22 = vector.broadcast %cst_8 : f32 to vector<8x256xf32>
      %23 = arith.select %19, %21, %22 : vector<8x256xi1>, vector<8x256xf32>
      %24 = arith.mulf %10, %10 : vector<8x256xf32>
      %25 = arith.mulf %12, %12 : vector<8x256xf32>
      %26 = arith.mulf %10, %12 : vector<8x256xf32>
      %27 = arith.mulf %10, %17 : vector<8x256xf32>
      %28 = vector.extract_strided_slice %10 {offsets = [0, 0], sizes = [8, 128], strides = [1, 1]} : vector<8x256xf32> to vector<8x128xf32>
      %29 = vector.extract_strided_slice %10 {offsets = [0, 128], sizes = [8, 128], strides = [1, 1]} : vector<8x256xf32> to vector<8x128xf32>
      %30 = arith.addf %28, %29 : vector<8x128xf32>
      %31 = vector.extract_strided_slice %12 {offsets = [0, 0], sizes = [8, 128], strides = [1, 1]} : vector<8x256xf32> to vector<8x128xf32>
      %32 = vector.extract_strided_slice %12 {offsets = [0, 128], sizes = [8, 128], strides = [1, 1]} : vector<8x256xf32> to vector<8x128xf32>
      %33 = arith.addf %31, %32 : vector<8x128xf32>
      %34 = vector.extract_strided_slice %24 {offsets = [0, 0], sizes = [8, 128], strides = [1, 1]} : vector<8x256xf32> to vector<8x128xf32>
      %35 = vector.extract_strided_slice %24 {offsets = [0, 128], sizes = [8, 128], strides = [1, 1]} : vector<8x256xf32> to vector<8x128xf32>
      %36 = arith.addf %34, %35 : vector<8x128xf32>
      %37 = vector.extract_strided_slice %25 {offsets = [0, 0], sizes = [8, 128], strides = [1, 1]} : vector<8x256xf32> to vector<8x128xf32>
      %38 = vector.extract_strided_slice %25 {offsets = [0, 128], sizes = [8, 128], strides = [1, 1]} : vector<8x256xf32> to vector<8x128xf32>
      %39 = arith.addf %37, %38 : vector<8x128xf32>
      %40 = vector.extract_strided_slice %26 {offsets = [0, 0], sizes = [8, 128], strides = [1, 1]} : vector<8x256xf32> to vector<8x128xf32>
      %41 = vector.extract_strided_slice %26 {offsets = [0, 128], sizes = [8, 128], strides = [1, 1]} : vector<8x256xf32> to vector<8x128xf32>
      %42 = arith.addf %40, %41 : vector<8x128xf32>
      %43 = vector.extract_strided_slice %23 {offsets = [0, 0], sizes = [8, 128], strides = [1, 1]} : vector<8x256xf32> to vector<8x128xf32>
      %44 = vector.extract_strided_slice %23 {offsets = [0, 128], sizes = [8, 128], strides = [1, 1]} : vector<8x256xf32> to vector<8x128xf32>
      %45 = arith.addf %43, %44 : vector<8x128xf32>
      %46 = vector.extract_strided_slice %17 {offsets = [0, 0], sizes = [8, 128], strides = [1, 1]} : vector<8x256xf32> to vector<8x128xf32>
      %47 = vector.extract_strided_slice %17 {offsets = [0, 128], sizes = [8, 128], strides = [1, 1]} : vector<8x256xf32> to vector<8x128xf32>
      %48 = arith.addf %46, %47 : vector<8x128xf32>
      %49 = vector.extract_strided_slice %27 {offsets = [0, 0], sizes = [8, 128], strides = [1, 1]} : vector<8x256xf32> to vector<8x128xf32>
      %50 = vector.extract_strided_slice %27 {offsets = [0, 128], sizes = [8, 128], strides = [1, 1]} : vector<8x256xf32> to vector<8x128xf32>
      %51 = arith.addf %49, %50 : vector<8x128xf32>
      %52 = arith.index_cast %8 : i32 to index
      %c0_9 = arith.constant 0 : index
      %53 = vector.load %arg6[%52, %c0_9] : memref<32x1024xf32, #tpu.memory_space<vmem>>, vector<8x128xf32>
      %54 = arith.addf %53, %30 : vector<8x128xf32>
      %55 = arith.index_cast %8 : i32 to index
      %c0_10 = arith.constant 0 : index
      %56 = vector.load %arg6[%55, %c0_10] : memref<32x1024xf32, #tpu.memory_space<vmem>>, vector<8x128xf32>
      tpu.vector_store %arg6[%55, %c0_10], %54 {strides = array<i32>} : memref<32x1024xf32, #tpu.memory_space<vmem>>, vector<8x128xf32>,
      %57 = arith.index_cast %8 : i32 to index
      %c128 = arith.constant 128 : index
      %58 = vector.load %arg6[%57, %c128] : memref<32x1024xf32, #tpu.memory_space<vmem>>, vector<8x128xf32>
      %59 = arith.addf %58, %33 : vector<8x128xf32>
      %60 = arith.index_cast %8 : i32 to index
      %c128_11 = arith.constant 128 : index
      %61 = vector.load %arg6[%60, %c128_11] : memref<32x1024xf32, #tpu.memory_space<vmem>>, vector<8x128xf32>
      tpu.vector_store %arg6[%60, %c128_11], %59 {strides = array<i32>} : memref<32x1024xf32, #tpu.memory_space<vmem>>, vector<8x128xf32>,
      %62 = arith.index_cast %8 : i32 to index
      %c256 = arith.constant 256 : index
      %63 = vector.load %arg6[%62, %c256] : memref<32x1024xf32, #tpu.memory_space<vmem>>, vector<8x128xf32>
      %64 = arith.addf %63, %36 : vector<8x128xf32>
      %65 = arith.index_cast %8 : i32 to index
      %c256_12 = arith.constant 256 : index
      %66 = vector.load %arg6[%65, %c256_12] : memref<32x1024xf32, #tpu.memory_space<vmem>>, vector<8x128xf32>
      tpu.vector_store %arg6[%65, %c256_12], %64 {strides = array<i32>} : memref<32x1024xf32, #tpu.memory_space<vmem>>, vector<8x128xf32>,
      %67 = arith.index_cast %8 : i32 to index
      %c384 = arith.constant 384 : index
      %68 = vector.load %arg6[%67, %c384] : memref<32x1024xf32, #tpu.memory_space<vmem>>, vector<8x128xf32>
      %69 = arith.addf %68, %39 : vector<8x128xf32>
      %70 = arith.index_cast %8 : i32 to index
      %c384_13 = arith.constant 384 : index
      %71 = vector.load %arg6[%70, %c384_13] : memref<32x1024xf32, #tpu.memory_space<vmem>>, vector<8x128xf32>
      tpu.vector_store %arg6[%70, %c384_13], %69 {strides = array<i32>} : memref<32x1024xf32, #tpu.memory_space<vmem>>, vector<8x128xf32>,
      %72 = arith.index_cast %8 : i32 to index
      %c512 = arith.constant 512 : index
      %73 = vector.load %arg6[%72, %c512] : memref<32x1024xf32, #tpu.memory_space<vmem>>, vector<8x128xf32>
      %74 = arith.addf %73, %42 : vector<8x128xf32>
      %75 = arith.index_cast %8 : i32 to index
      %c512_14 = arith.constant 512 : index
      %76 = vector.load %arg6[%75, %c512_14] : memref<32x1024xf32, #tpu.memory_space<vmem>>, vector<8x128xf32>
      tpu.vector_store %arg6[%75, %c512_14], %74 {strides = array<i32>} : memref<32x1024xf32, #tpu.memory_space<vmem>>, vector<8x128xf32>,
      %77 = arith.index_cast %8 : i32 to index
      %c640 = arith.constant 640 : index
      %78 = vector.load %arg6[%77, %c640] : memref<32x1024xf32, #tpu.memory_space<vmem>>, vector<8x128xf32>
      %79 = arith.addf %78, %45 : vector<8x128xf32>
      %80 = arith.index_cast %8 : i32 to index
      %c640_15 = arith.constant 640 : index
      %81 = vector.load %arg6[%80, %c640_15] : memref<32x1024xf32, #tpu.memory_space<vmem>>, vector<8x128xf32>
      tpu.vector_store %arg6[%80, %c640_15], %79 {strides = array<i32>} : memref<32x1024xf32, #tpu.memory_space<vmem>>, vector<8x128xf32>,
      %82 = arith.index_cast %8 : i32 to index
      %c768 = arith.constant 768 : index
      %83 = vector.load %arg6[%82, %c768] : memref<32x1024xf32, #tpu.memory_space<vmem>>, vector<8x128xf32>
      %84 = arith.addf %83, %48 : vector<8x128xf32>
      %85 = arith.index_cast %8 : i32 to index
      %c768_16 = arith.constant 768 : index
      %86 = vector.load %arg6[%85, %c768_16] : memref<32x1024xf32, #tpu.memory_space<vmem>>, vector<8x128xf32>
      tpu.vector_store %arg6[%85, %c768_16], %84 {strides = array<i32>} : memref<32x1024xf32, #tpu.memory_space<vmem>>, vector<8x128xf32>,
      %87 = arith.index_cast %8 : i32 to index
      %c896 = arith.constant 896 : index
      %88 = vector.load %arg6[%87, %c896] : memref<32x1024xf32, #tpu.memory_space<vmem>>, vector<8x128xf32>
      %89 = arith.addf %88, %51 : vector<8x128xf32>
      %90 = arith.index_cast %8 : i32 to index
      %c896_17 = arith.constant 896 : index
      %91 = vector.load %arg6[%90, %c896_17] : memref<32x1024xf32, #tpu.memory_space<vmem>>, vector<8x128xf32>
      tpu.vector_store %arg6[%90, %c896_17], %89 {strides = array<i32>} : memref<32x1024xf32, #tpu.memory_space<vmem>>, vector<8x128xf32>,
    }
    %c4_i32_2 = arith.constant 4 : i32
    %c0_i32_3 = arith.constant 0 : i32
    %4 = arith.cmpi eq, %arg1, %c0_i32_3 : i32
    %5 = arith.extui %4 : i1 to i32
    %c0_i32_4 = arith.constant 0 : i32
    %6 = arith.cmpi ne, %5, %c0_i32_4 : i32
    scf.if %6 {
      %c0 = arith.constant 0 : index
      %c0_5 = arith.constant 0 : index
      %7 = vector.load %arg6[%c0, %c0_5] : memref<32x1024xf32, #tpu.memory_space<vmem>>, vector<32x128xf32>
      %cst = arith.constant dense<0.000000e+00> : vector<32xf32>
      %8 = vector.multi_reduction <add>, %7, %cst [1] : vector<32x128xf32> to vector<32xf32>
      %9 = vector.shape_cast %8 : vector<32xf32> to vector<32x1xf32>
      %c0_6 = arith.constant 0 : index
      %c128 = arith.constant 128 : index
      %10 = vector.load %arg6[%c0_6, %c128] : memref<32x1024xf32, #tpu.memory_space<vmem>>, vector<32x128xf32>
      %cst_7 = arith.constant dense<0.000000e+00> : vector<32xf32>
      %11 = vector.multi_reduction <add>, %10, %cst_7 [1] : vector<32x128xf32> to vector<32xf32>
      %12 = vector.shape_cast %11 : vector<32xf32> to vector<32x1xf32>
      %c0_8 = arith.constant 0 : index
      %c256 = arith.constant 256 : index
      %13 = vector.load %arg6[%c0_8, %c256] : memref<32x1024xf32, #tpu.memory_space<vmem>>, vector<32x128xf32>
      %cst_9 = arith.constant dense<0.000000e+00> : vector<32xf32>
      %14 = vector.multi_reduction <add>, %13, %cst_9 [1] : vector<32x128xf32> to vector<32xf32>
      %15 = vector.shape_cast %14 : vector<32xf32> to vector<32x1xf32>
      %c0_10 = arith.constant 0 : index
      %c384 = arith.constant 384 : index
      %16 = vector.load %arg6[%c0_10, %c384] : memref<32x1024xf32, #tpu.memory_space<vmem>>, vector<32x128xf32>
      %cst_11 = arith.constant dense<0.000000e+00> : vector<32xf32>
      %17 = vector.multi_reduction <add>, %16, %cst_11 [1] : vector<32x128xf32> to vector<32xf32>
      %18 = vector.shape_cast %17 : vector<32xf32> to vector<32x1xf32>
      %c0_12 = arith.constant 0 : index
      %c512 = arith.constant 512 : index
      %19 = vector.load %arg6[%c0_12, %c512] : memref<32x1024xf32, #tpu.memory_space<vmem>>, vector<32x128xf32>
      %cst_13 = arith.constant dense<0.000000e+00> : vector<32xf32>
      %20 = vector.multi_reduction <add>, %19, %cst_13 [1] : vector<32x128xf32> to vector<32xf32>
      %21 = vector.shape_cast %20 : vector<32xf32> to vector<32x1xf32>
      %c0_14 = arith.constant 0 : index
      %c640 = arith.constant 640 : index
      %22 = vector.load %arg6[%c0_14, %c640] : memref<32x1024xf32, #tpu.memory_space<vmem>>, vector<32x128xf32>
      %cst_15 = arith.constant dense<0.000000e+00> : vector<32xf32>
      %23 = vector.multi_reduction <add>, %22, %cst_15 [1] : vector<32x128xf32> to vector<32xf32>
      %24 = vector.shape_cast %23 : vector<32xf32> to vector<32x1xf32>
      %c0_16 = arith.constant 0 : index
      %c768 = arith.constant 768 : index
      %25 = vector.load %arg6[%c0_16, %c768] : memref<32x1024xf32, #tpu.memory_space<vmem>>, vector<32x128xf32>
      %cst_17 = arith.constant dense<0.000000e+00> : vector<32xf32>
      %26 = vector.multi_reduction <add>, %25, %cst_17 [1] : vector<32x128xf32> to vector<32xf32>
      %27 = vector.shape_cast %26 : vector<32xf32> to vector<32x1xf32>
      %c0_18 = arith.constant 0 : index
      %c896 = arith.constant 896 : index
      %28 = vector.load %arg6[%c0_18, %c896] : memref<32x1024xf32, #tpu.memory_space<vmem>>, vector<32x128xf32>
      %cst_19 = arith.constant dense<0.000000e+00> : vector<32xf32>
      %29 = vector.multi_reduction <add>, %28, %cst_19 [1] : vector<32x128xf32> to vector<32xf32>
      %30 = vector.shape_cast %29 : vector<32xf32> to vector<32x1xf32>
      %c32_i32 = arith.constant 32 : i32
      %31 = arith.muli %arg0, %c32_i32 : i32
      %32 = tpu.iota {dimensions = array<i32: 0>} : vector<32x1xi32>
      %33 = vector.broadcast %31 : i32 to vector<32x1xi32>
      %34 = arith.addi %33, %32 : vector<32x1xi32>
      %c8_i32 = arith.constant 8 : i32
      %35 = vector.broadcast %c8_i32 : i32 to vector<32x1xi32>
      %36 = arith.cmpi slt, %34, %35 : vector<32x1xi32>
      %37 = arith.subf %24, %21 : vector<32x1xf32>
      %38 = arith.mulf %9, %12 : vector<32x1xf32>
      %cst_20 = arith.constant 3.906250e-03 : f32
      %39 = vector.broadcast %cst_20 : f32 to vector<32x1xf32>
      %40 = arith.mulf %38, %39 : vector<32x1xf32>
      %41 = arith.subf %21, %40 : vector<32x1xf32>
      %42 = arith.mulf %9, %9 : vector<32x1xf32>
      %cst_21 = arith.constant 3.906250e-03 : f32
      %43 = vector.broadcast %cst_21 : f32 to vector<32x1xf32>
      %44 = arith.mulf %42, %43 : vector<32x1xf32>
      %45 = arith.subf %15, %44 : vector<32x1xf32>
      %cst_22 = arith.constant 0.000000e+00 : f32
      %46 = vector.broadcast %cst_22 : f32 to vector<32x1xf32>
      %47 = arith.maximumf %45, %46 : vector<32x1xf32>
      %48 = arith.mulf %12, %12 : vector<32x1xf32>
      %cst_23 = arith.constant 3.906250e-03 : f32
      %49 = vector.broadcast %cst_23 : f32 to vector<32x1xf32>
      %50 = arith.mulf %48, %49 : vector<32x1xf32>
      %51 = arith.subf %18, %50 : vector<32x1xf32>
      %cst_24 = arith.constant 0.000000e+00 : f32
      %52 = vector.broadcast %cst_24 : f32 to vector<32x1xf32>
      %53 = arith.maximumf %51, %52 : vector<32x1xf32>
      %cst_25 = arith.constant 0.000000e+00 : f32
      %54 = vector.broadcast %cst_25 : f32 to vector<32x1xf32>
      %55 = arith.subf %54, %41 : vector<32x1xf32>
      %56 = arith.mulf %47, %53 : vector<32x1xf32>
      %cst_26 = arith.constant 1.000000e-30 : f32
      %57 = vector.broadcast %cst_26 : f32 to vector<32x1xf32>
      %58 = arith.maximumf %56, %57 : vector<32x1xf32>
      %59 = math.rsqrt %58 : vector<32x1xf32>
      %60 = arith.mulf %55, %59 : vector<32x1xf32>
      %cst_27 = arith.constant 0.00392156886 : f32
      %61 = vector.broadcast %cst_27 : f32 to vector<32x1xf32>
      %62 = arith.mulf %47, %61 : vector<32x1xf32>
      %cst_28 = arith.constant 1.000000e-30 : f32
      %63 = vector.broadcast %cst_28 : f32 to vector<32x1xf32>
      %64 = arith.maximumf %62, %63 : vector<32x1xf32>
      %65 = math.rsqrt %64 : vector<32x1xf32>
      %cst_29 = arith.constant 0.000000e+00 : f32
      %66 = vector.broadcast %cst_29 : f32 to vector<32x1xf32>
      %67 = arith.cmpf ogt, %27, %66 : vector<32x1xf32>
      %cst_30 = arith.constant 3.906250e-03 : f32
      %68 = vector.broadcast %cst_30 : f32 to vector<32x1xf32>
      %69 = arith.mulf %9, %68 : vector<32x1xf32>
      %70 = arith.mulf %69, %27 : vector<32x1xf32>
      %71 = arith.subf %30, %70 : vector<32x1xf32>
      %72 = arith.mulf %65, %71 : vector<32x1xf32>
      %cst_31 = arith.constant 0.000000e+00 : f32
      %73 = vector.broadcast %cst_31 : f32 to vector<32x1xf32>
      %74 = arith.subf %73, %72 : vector<32x1xf32>
      %75 = arith.divf %74, %27 : vector<32x1xf32>
      %cst_32 = arith.constant 1.000000e+00 : f32
      %76 = vector.broadcast %cst_32 : f32 to vector<32x1xf32>
      %77 = arith.select %67, %75, %76 : vector<32x1xi1>, vector<32x1xf32>
      %cst_33 = arith.constant 0.000000e+00 : f32
      %78 = vector.broadcast %cst_33 : f32 to vector<32x1xf32>
      %79 = arith.select %36, %37, %78 : vector<32x1xi1>, vector<32x1xf32>
      %80 = vector.shape_cast %79 : vector<32x1xf32> to vector<1x32x1xf32>
      %cst_34 = arith.constant dense<0.000000e+00> : vector<1xf32>
      %81 = vector.multi_reduction <add>, %80, %cst_34 [1, 2] : vector<1x32x1xf32> to vector<1xf32>
      %82 = vector.shape_cast %81 : vector<1xf32> to vector<1x1x1xf32>
      %83 = vector.extract %82[0, 0, 0] : f32 from vector<1x1x1xf32>
      %84 = vector.broadcast %83 : f32 to vector<1x1xf32>
      %cst_35 = arith.constant 0.000000e+00 : f32
      %85 = vector.broadcast %cst_35 : f32 to vector<32x1xf32>
      %86 = arith.select %36, %60, %85 : vector<32x1xi1>, vector<32x1xf32>
      %87 = vector.shape_cast %86 : vector<32x1xf32> to vector<1x32x1xf32>
      %cst_36 = arith.constant dense<0.000000e+00> : vector<1xf32>
      %88 = vector.multi_reduction <add>, %87, %cst_36 [1, 2] : vector<1x32x1xf32> to vector<1xf32>
      %89 = vector.shape_cast %88 : vector<1xf32> to vector<1x1x1xf32>
      %90 = vector.extract %89[0, 0, 0] : f32 from vector<1x1x1xf32>
      %91 = vector.broadcast %90 : f32 to vector<1x1xf32>
      %cst_37 = arith.constant 0.000000e+00 : f32
      %92 = vector.broadcast %cst_37 : f32 to vector<32x1xf32>
      %93 = arith.select %36, %77, %92 : vector<32x1xi1>, vector<32x1xf32>
      %94 = vector.shape_cast %93 : vector<32x1xf32> to vector<1x32x1xf32>
      %cst_38 = arith.constant dense<0.000000e+00> : vector<1xf32>
      %95 = vector.multi_reduction <add>, %94, %cst_38 [1, 2] : vector<1x32x1xf32> to vector<1xf32>
      %96 = vector.shape_cast %95 : vector<1xf32> to vector<1x1x1xf32>
      %97 = vector.extract %96[0, 0, 0] : f32 from vector<1x1x1xf32>
      %98 = vector.broadcast %97 : f32 to vector<1x1xf32>
      %cst_39 = arith.constant 5.000000e+00 : f32
      %99 = vector.broadcast %cst_39 : f32 to vector<1x1xf32>
      %100 = arith.mulf %99, %84 : vector<1x1xf32>
      %cst_40 = arith.constant 4.8828125E-4 : f32
      %101 = vector.broadcast %cst_40 : f32 to vector<1x1xf32>
      %102 = arith.mulf %100, %101 : vector<1x1xf32>
      %103 = arith.addf %91, %98 : vector<1x1xf32>
      %cst_41 = arith.constant 1.250000e-01 : f32
      %104 = vector.broadcast %cst_41 : f32 to vector<1x1xf32>
      %105 = arith.mulf %103, %104 : vector<1x1xf32>
      %106 = arith.addf %102, %105 : vector<1x1xf32>
      %107 = vector.shape_cast %106 : vector<1x1xf32> to vector<1x1x1xf32>
      %c0_42 = arith.constant 0 : index
      %c0_43 = arith.constant 0 : index
      %c0_44 = arith.constant 0 : index
      %108 = vector.load %arg5[%c0_42, %c0_43, %c0_44] : memref<1x1x1xf32, #tpu.memory_space<vmem>>, vector<1x1x1xf32>
      tpu.vector_store %arg5[%c0_42, %c0_43, %c0_44], %107 {strides = array<i32>} : memref<1x1x1xf32, #tpu.memory_space<vmem>>, vector<1x1x1xf32>,
    } else {
    }
    return
  }
  func.func @transform_0(%arg0: i32, %arg1: i32) -> (i32, i32) {
    %c0_i32 = arith.constant 0 : i32
    return %arg0, %arg1 : i32, i32
  }
  func.func @transform_1(%arg0: i32, %arg1: i32) -> (i32, i32) {
    %c0_i32 = arith.constant 0 : i32
    return %arg0, %arg1 : i32, i32
  }
  func.func @transform_2(%arg0: i32, %arg1: i32) -> (i32, i32) {
    %c0_i32 = arith.constant 0 : i32
    return %arg0, %arg1 : i32, i32
  }
  func.func @transform_3(%arg0: i32, %arg1: i32) -> (i32, i32, i32) {
    %c0_i32 = arith.constant 0 : i32
    %c0_i32_0 = arith.constant 0 : i32
    %c0_i32_1 = arith.constant 0 : i32
    return %arg0, %c0_i32, %c0_i32_0 : i32, i32, i32
  }
}

</mosaic_0001>

<bundles_post_ra>
// kernel: tpu_custom_call.1
= control target key start
LH: loop header
LB: loop body
LE: loop exit
PB: predicated region body
PF: predicated region fallthrough
CT: control target
= control target key end

     0   :  { %8 = vsyncpa [#allocation4], 0  ;;  %s789_s0 = inlined_call_operand.vmem [shape: f32[8,256], index: 0, kind: input, shape index: {}]   ;;  %s790_s1 = inlined_call_operand.hbm [shape: f32[8,256], index: 1, kind: input, shape index: {}]   ;;  %s791_s2 = inlined_call_operand.vmem [shape: s32[8,256], index: 2, kind: input, shape index: {}]   ;;  %s792_s3 = inlined_call_operand.hbm [shape: f32[1,1,1], index: 3, kind: output, shape index: {}]  }
   0x1   :  { %9 = vsyncpa [#allocation5], 0 }
   0x2   :  { %15 = vsyncadd [#allocation4], 768  ;;  %s16_s14 = sshll.u32 %s790_s1, 4  ;;  %s706_s15 = smov [#allocation3]   ;;  %s17_s14 = int_to_ptr.hbm [resolvable:$true] %s16_s14 }
   0x3   :  { %s18_s16 = sshll.u32 %s706_s15, 4  ;;  %s707_s17 = smov 256   ;;  %s19_s16 = int_to_ptr.vmem [resolvable:$true] %s18_s16 }
   0x4   :  { %s708_s18 = smov 16  }
   0x5   :  { %24 = dma.hbm_to_vmem [thread:$0]  %s17_s14, 256, %s19_s16, [#allocation4], %s707_s17, %s707_s17, %s708_s18  }
   0x6   :  { %698 = dma.done.wait [#allocation4], 1024  }
   0x7   :  { %699 = vsyncadd [#allocation4], 4294966272  ;;  %v709_v0 = vmov 0.0   ;;  %s735_s1 = smov 0  }
   0x8   :  { %35 = vst [vmem:[#allocation2] sm:$0xff] %v709_v0 }
   0x9   :  { %36 = vst [vmem:[#allocation2 + $0x8] sm:$0xff] %v709_v0 }
   0xa   :  { %37 = vst [vmem:[#allocation2 + $0x10] sm:$0xff] %v709_v0 }
   0xb   :  { %38 = vst [vmem:[#allocation2 + $0x18] sm:$0xff] %v709_v0 }
   0xc   :  { %39 = vst [vmem:[#allocation2 + $0x20] sm:$0xff] %v709_v0 }
   0xd   :  { %40 = vst [vmem:[#allocation2 + $0x28] sm:$0xff] %v709_v0 }
   0xe   :  { %41 = vst [vmem:[#allocation2 + $0x30] sm:$0xff] %v709_v0 }
   0xf   :  { %42 = vst [vmem:[#allocation2 + $0x38] sm:$0xff] %v709_v0 }
  0x10   :  { %43 = vst [vmem:[#allocation2 + $0x40] sm:$0xff] %v709_v0 }
  0x11   :  { %44 = vst [vmem:[#allocation2 + $0x48] sm:$0xff] %v709_v0 }
  0x12   :  { %45 = vst [vmem:[#allocation2 + $0x50] sm:$0xff] %v709_v0 }
  0x13   :  { %46 = vst [vmem:[#allocation2 + $0x58] sm:$0xff] %v709_v0 }
  0x14   :  { %47 = vst [vmem:[#allocation2 + $0x60] sm:$0xff] %v709_v0 }
  0x15   :  { %48 = vst [vmem:[#allocation2 + $0x68] sm:$0xff] %v709_v0 }
  0x16   :  { %49 = vst [vmem:[#allocation2 + $0x70] sm:$0xff] %v709_v0 }
  0x17   :  { %50 = vst [vmem:[#allocation2 + $0x78] sm:$0xff] %v709_v0 }
  0x18   :  { %51 = vst [vmem:[#allocation2 + $0x80] sm:$0xff] %v709_v0 }
  0x19   :  { %52 = vst [vmem:[#allocation2 + $0x88] sm:$0xff] %v709_v0 }
  0x1a   :  { %53 = vst [vmem:[#allocation2 + $0x90] sm:$0xff] %v709_v0 }
  0x1b   :  { %54 = vst [vmem:[#allocation2 + $0x98] sm:$0xff] %v709_v0 }
  0x1c   :  { %55 = vst [vmem:[#allocation2 + $0xa0] sm:$0xff] %v709_v0 }
  0x1d   :  { %56 = vst [vmem:[#allocation2 + $0xa8] sm:$0xff] %v709_v0 }
  0x1e   :  { %57 = vst [vmem:[#allocation2 + $0xb0] sm:$0xff] %v709_v0 }
  0x1f   :  { %58 = vst [vmem:[#allocation2 + $0xb8] sm:$0xff] %v709_v0 }
  0x20   :  { %59 = vst [vmem:[#allocation2 + $0xc0] sm:$0xff] %v709_v0 }
  0x21   :  { %60 = vst [vmem:[#allocation2 + $0xc8] sm:$0xff] %v709_v0 }
  0x22   :  { %61 = vst [vmem:[#allocation2 + $0xd0] sm:$0xff] %v709_v0 }
  0x23   :  { %62 = vst [vmem:[#allocation2 + $0xd8] sm:$0xff] %v709_v0 }
  0x24   :  { %63 = vst [vmem:[#allocation2 + $0xe0] sm:$0xff] %v709_v0 }
  0x25   :  { %64 = vst [vmem:[#allocation2 + $0xe8] sm:$0xff] %v709_v0 }
  0x26   :  { %65 = vst [vmem:[#allocation2 + $0xf0] sm:$0xff] %v709_v0 }
  0x27   :  { %66 = vst [vmem:[#allocation2 + $0xf8] sm:$0xff] %v709_v0 }
  0x28 LB: > { %s603_s19 = sshll.u32 %s704_s1, 3  ;;  %v710_v28 = vmov 0.0   ;;  %s72_s1 = sadd.s32 1, %s704_s1   ;;  %s704_s1 = sphi %s735_s1, %s72_s1  }
  0x29   : > { %s74_s20 = sshra.s32 %s603_s19, 3  ;;  %p69_p0 = scmp.ge.s32.totalorder %s72_s1, 4  }
  0x2a   : > { %s612_s21 = sshll.u32 %s74_s20, 4  ;;  %s615_s22 = sshll.u32 %s74_s20, 6  ;;  %vm506_vm4 = vcmask (%p69_p0), 7168  }
  0x2b   : > { %s78_s25 = scalar_lea.vmem %s789_s0, %s612_s21  ;;  %s82_s26 = scalar_lea.vmem [#allocation3], %s612_s21 }
  0x2c   : > { %v79_v1 = vld [vmem:[%s78_s25] sm:$0xff]  ;;  %v80_v2 = vld [vmem:[%s78_s25 + $0x8] sm:$0xff]  ;;  %s86_s29 = scalar_lea.vmem %s791_s2, %s612_s21  ;;  %s747_s30 = scalar_lea.vmem [#allocation2], %s615_s22 }
  0x2d   : > { %v83_v3 = vld [vmem:[%s82_s26] sm:$0xff]  ;;  %v113_v4 = vadd.f32 %v80_v2, %v79_v1  ;;  %v84_v6 = vld [vmem:[%s82_s26 + $0x8] sm:$0xff]  ;;  %v105_v8 = vmul.f32 %v79_v1, %v79_v1  ;;  %v106_v9 = vmul.f32 %v80_v2, %v80_v2  ;;  %s711_s5 = smov (%p69_p0), [#allocation6]   ;;  %s580_s9 = sshll.u32 (%p69_p0), %s792_s3, 4  ;;  %s581_s9 = int_to_ptr.hbm [resolvable:$true] %s580_s9 }
  0x2e   : > { %v124_v5 = vld [vmem:[%s747_s30] sm:$0xff]  ;;  %v127_v7 = vld [vmem:[%s747_s30 + $0x8] sm:$0xff]  ;;  %v107_v10 = vmul.f32 %v83_v3, %v83_v3  ;;  %v114_v11 = vadd.f32 %v84_v6, %v83_v3  ;;  %v130_v12 = vld [vmem:[%s747_s30 + $0x10] sm:$0xff]  ;;  %v108_v13 = vmul.f32 %v84_v6, %v84_v6  ;;  %v109_v15 = vmul.f32 %v83_v3, %v79_v1  ;;  %s578_s6 = sshll.u32 (%p69_p0), %s711_s5, 4  ;;  %s579_s6 = int_to_ptr.vmem [resolvable:$true] %s578_s6 }
  0x2f   : > { %v133_v14 = vld [vmem:[%s747_s30 + $0x18] sm:$0xff]  ;;  %v110_v16 = vmul.f32 %v84_v6, %v80_v2  ;;  %v125_v17 = vadd.f32 %v124_v5, %v113_v4  ;;  %v115_v18 = vadd.f32 %v106_v9, %v105_v8  ;;  %v136_v19 = vld [vmem:[%s747_s30 + $0x20] sm:$0xff]  ;;  %v88_v21 = vld [vmem:[%s86_s29 + $0x8] sm:$0xff]  ;;  %636 = vlog2.f32 %v83_v3 }
  0x30   : > { %v87_v20 = vld [vmem:[%s86_s29] sm:$0xff]  ;;  %v128_v22 = vadd.f32 %v127_v7, %v114_v11  ;;  %v116_v23 = vadd.f32 %v108_v13, %v107_v10  ;;  %638 = vlog2.f32 %v84_v6  ;;  %vm90_vm1 = vcmp.ne.s32.totalorder %v88_v21, 0  ;;  %v142_v31 = vld [vmem:[%s747_s30 + $0x30] sm:$0xff]  ;;  %v145_v35 = vld [vmem:[%s747_s30 + $0x38] sm:$0xff] }
  0x31   : > { %v117_v24 = vadd.f32 %v110_v16, %v109_v15  ;;  %126 = vst [vmem:[%s747_s30] sm:$0xff] %v125_v17  ;;  %v131_v25 = vadd.f32 %v130_v12, %v115_v18  ;;  %vm89_vm0 = vcmp.ne.s32.totalorder %v87_v20, 0  ;;  %v609_v30 = vsel %vm90_vm1, 1.0, %v710_v28  ;;  %v139_v47 = vld [vmem:[%s747_s30 + $0x28] sm:$0xff] }
  0x32   : > { %129 = vst [vmem:[%s747_s30 + $0x8] sm:$0xff] %v128_v22  ;;  %v134_v26 = vadd.f32 %v133_v14, %v116_v23  ;;  %v608_v29 = vsel %vm89_vm0, 1.0, %v710_v28  ;;  %v112_v34 = vmul.f32 %v609_v30, %v80_v2  ;;  %vm95_vm2 = vcmp.gt.f32.partialorder %v83_v3, 0.0 }
  0x33   : > { %v137_v27 = vadd.f32 %v136_v19, %v117_v24  ;;  %132 = vst [vmem:[%s747_s30 + $0x10] sm:$0xff] %v131_v25  ;;  %v119_v32 = vadd.f32 %v609_v30, %v608_v29  ;;  %v111_v33 = vmul.f32 %v608_v29, %v79_v1  ;;  %vm96_vm3 = vcmp.gt.f32.partialorder %v84_v6, 0.0 }
  0x34   : > { %135 = vst [vmem:[%s747_s30 + $0x18] sm:$0xff] %v134_v26  ;;  %vm571_vm0 = vcmask (%p69_p0), 0  }
  0x35   : > { %138 = vst [vmem:[%s747_s30 + $0x20] sm:$0xff] %v137_v27  ;;  %v143_v36 = vadd.f32 %v142_v31, %v119_v32  ;;  %v120_v37 = vadd.f32 %v112_v34, %v111_v33  ;;  %v637_v38 = vpop.eup %636 }
  0x36   : > { %v639_v39 = vpop.eup %638  ;;  %v98_v40 = vmul.f32 0.6931472, %v637_v38 }
  0x37   : > { %144 = vst [vmem:[%s747_s30 + $0x30] sm:$0xff] %v143_v36  ;;  %v146_v41 = vadd.f32 %v145_v35, %v120_v37  ;;  %v100_v42 = vmul.f32 0.6931472, %v639_v39 }
  0x38   : > { %v101_v43 = vmul.f32 %v98_v40, %v83_v3 }
  0x39   : > { %147 = vst [vmem:[%s747_s30 + $0x38] sm:$0xff] %v146_v41  ;;  %v102_v44 = vmul.f32 %v100_v42, %v84_v6 }
  0x3a   : > { %v103_v45 = vsel %vm95_vm2, %v101_v43, 0.0 }
  0x3b   : > { %v104_v46 = vsel %vm96_vm3, %v102_v44, 0.0 }
  0x3c   : > { %v118_v48 = vadd.f32 %v104_v46, %v103_v45  ;;  %71 = sbr.rel (!%p69_p0) target bundleno = 40 (0x28), region = 55 }
  0x3e   : > { %v140_v49 = vadd.f32 %v139_v47, %v118_v48 }
  0x40   : > { %141 = vst [vmem:[%s747_s30 + $0x28] sm:$0xff] %v140_v49 }
  0x47   :  { %v223_v50 = vld [vmem:[#allocation2 + $0x30] sm:$0xff]  ;;  %v163_v51 = vld [vmem:[#allocation2 + $0x8] sm:$0xff]  ;;  %v151_v52 = vld [vmem:[#allocation2] sm:$0xff] }
  0x48   :  { %227 = vadd.xlane.f32.xlu2 %v223_v50  ;;  %167 = vadd.xlane.f32.xlu1 %v163_v51  ;;  %v235_v53 = vld [vmem:[#allocation2 + $0x38] sm:$0xff]  ;;  %v175_v55 = vld [vmem:[#allocation2 + $0x10] sm:$0xff]  ;;  %v211_v56 = vld [vmem:[#allocation2 + $0x28] sm:$0xff] }
  0x49   :  { %155 = vadd.xlane.f32.xlu0 %v151_v52  ;;  %v187_v54 = vld [vmem:[#allocation2 + $0x18] sm:$0xff]  ;;  %v199_v57 = vld [vmem:[#allocation2 + $0x20] sm:$0xff] }
  0x50   :  { %239 = vadd.xlane.f32.xlu2 %v235_v53  ;;  %191 = vadd.xlane.f32.xlu1 %v187_v54 }
  0x51   :  { %179 = vadd.xlane.f32.xlu0 %v175_v55 }
  0x58   :  { %215 = vadd.xlane.f32.xlu1 %v211_v56 }
  0x59   :  { %203 = vadd.xlane.f32.xlu0 %v199_v57 }
  0xbb   :  { %v168_v58 = vpop.xlane.xlu1 %167  ;;  %v768_v4 = vpop.xlane.xlu2 %227 }
  0xbc   :  { %v294_v59 = vmul.f32 %v168_v58, %v168_v58  ;;  %v156_v60 = vpop.xlane.xlu0 %155  ;;  %640 = vrcp.f32 %v768_v4  ;;  %vm443_vm5 = vweird.f32 %v768_v4  ;;  %v447_v34 = vand.u32 2147483647, %v768_v4 }
  0xbd   :  { %v278_v61 = vmul.f32 %v156_v60, %v156_v60  ;;  %v266_v18 = vmul.f32 %v168_v58, %v156_v60  ;;  %v418_v26 = vmul.f32 0.00390625, %v156_v60  ;;  %v449_v35 = vand.u32 2147483648, %v768_v4 }
  0xbe   :  { %v298_v62 = vmul.f32 0.00390625, %v294_v59  ;;  %vm448_vm14 = vcmp.eq.f32.partialorder %v447_v34, 8.507059e+37  ;;  %vm414_vm15 = vcmp.gt.f32.partialorder %v768_v4, 0.0 }
  0xbf   :  { %v282_v0 = vmul.f32 0.00390625, %v278_v61  ;;  %v270_v25 = vmul.f32 0.00390625, %v266_v18  ;;  %v422_v36 = vmul.f32 %v418_v26, %v768_v4  ;;  %v450_v46 = vor.u32 1.1754944e-38, %v449_v35 }
  0xc2   :  { %v641_v13 = vpop.eup %640 }
  0xc3   :  { %v192_v63 = vpop.xlane.xlu1 %191  ;;  %v439_v16 = vmul.f32 %v641_v13, %v768_v4  ;;  %vm444_vm6 = vweird.f32 %v641_v13  ;;  %v240_v32 = vpop.xlane.xlu2 %239 }
  0xc4   :  { %v302_v1 = vsub.f32 %v192_v63, %v298_v62  ;;  %v180_v2 = vpop.xlane.xlu0 %179  ;;  %vm777_vm10 = vmor %vm443_vm5, %vm444_vm6  ;;  %v426_v42 = vsub.f32 %v240_v32, %v422_v36 }
  0xc5   :  { %v286_v3 = vsub.f32 %v180_v2, %v282_v0  ;;  %v440_v21 = vsub.f32 1.0, %v439_v16 }
  0xc6   :  { %v306_v5 = vmax.f32 %v302_v1, 0.0 }
  0xc7   :  { %v290_v6 = vmax.f32 %v286_v3, 0.0  ;;  %v441_v28 = vmul.f32 %v641_v13, %v440_v21 }
  0xc9   :  { %v314_v7 = vmul.f32 %v306_v5, %v290_v6  ;;  %v366_v8 = vmul.f32 0.003921569, %v290_v6  ;;  %v442_v38 = vadd.f32 %v641_v13, %v441_v28 }
  0xcb   :  { %v318_v9 = vmax.f32 %v314_v7, 1e-30  ;;  %v370_v10 = vmax.f32 %v366_v8, 1e-30  ;;  %v216_v11 = vpop.xlane.xlu1 %215  ;;  %v446_v48 = vsel %vm777_vm10, %v641_v13, %v442_v38 }
  0xcc   :  { %v204_v12 = vpop.xlane.xlu0 %203  ;;  %v451_v51 = vsel %vm448_vm14, %v450_v46, %v446_v48 }
  0xcd   :  { %642 = vrsqrt.f32 %v318_v9  ;;  %v262_v14 = vsub.f32 %v216_v11, %v204_v12  ;;  %v274_v30 = vsub.f32 %v204_v12, %v270_v25  ;;  %vm328_vm9 = vweird.f32 %v318_v9 }
  0xce   :  { %644 = vrsqrt.f32 %v370_v10  ;;  %vm380_vm11 = vweird.f32 %v370_v10 }
  0xcf   :  { %v507_v15 = vsel %vm506_vm4, %v262_v14, 0.0  ;;  %v310_v40 = vsub.f32 0.0, %v274_v30 }
  0xd0   :  { %514 = vadd.xlane.f32.xlu2 %v507_v15 }
  0xd3   :  { %v643_v17 = vpop.eup %642 }
  0xd4   :  { %v645_v19 = vpop.eup %644  ;;  %v323_v20 = vmul.f32 %v643_v17, %v318_v9  ;;  %vm329_vm7 = vweird.f32 %v643_v17 }
  0xd5   :  { %v375_v22 = vmul.f32 %v645_v19, %v370_v10  ;;  %vm381_vm8 = vweird.f32 %v645_v19  ;;  %vm330_vm12 = vmor %vm328_vm9, %vm329_vm7 }
  0xd6   :  { %v324_v23 = vmul.f32 %v643_v17, %v323_v20  ;;  %vm382_vm13 = vmor %vm380_vm11, %vm381_vm8 }
  0xd7   :  { %v376_v24 = vmul.f32 %v645_v19, %v375_v22 }
  0xd8   :  { %v325_v27 = vmul.f32 0.5, %v324_v23 }
  0xd9   :  { %v377_v29 = vmul.f32 0.5, %v376_v24 }
  0xda   :  { %v326_v31 = vsub.f32 1.5, %v325_v27 }
  0xdb   :  { %v378_v33 = vsub.f32 1.5, %v377_v29 }
  0xdc   :  { %v327_v37 = vmul.f32 %v643_v17, %v326_v31 }
  0xdd   :  { %v379_v41 = vmul.f32 %v645_v19, %v378_v33 }
  0xde   :  { %v331_v43 = vsel %vm330_vm12, %v643_v17, %v327_v37 }
  0xdf   :  { %v362_v44 = vmul.f32 %v331_v43, %v310_v40  ;;  %v383_v45 = vsel %vm382_vm13, %v645_v19, %v379_v41 }
  0xe0   :  { %v430_v47 = vmul.f32 %v426_v42, %v383_v45 }
  0xe1   :  { %v528_v49 = vsel %vm506_vm4, %v362_v44, 0.0 }
  0xe2   :  { %535 = vadd.xlane.f32.xlu0 %v528_v49  ;;  %v434_v50 = vsub.f32 0.0, %v430_v47 }
  0xe4   :  { %v452_v52 = vmul.f32 %v451_v51, %v434_v50 }
  0xe6   :  { %v498_v53 = vsel %vm414_vm15, %v452_v52, 1.0 }
  0xe7   :  { %v549_v54 = vsel %vm506_vm4, %v498_v53, 0.0 }
  0xe8   :  { %556 = vadd.xlane.f32.xlu1 %v549_v54 }
 0x143   :  { %v515_v55 = vpop.xlane.xlu2 %514 }
 0x144   :  { %v516_v56 = vrot.slane %v515_v55, 4 }
 0x146   :  { %v517_v57 = vadd.f32 %v516_v56, %v515_v55 }
 0x148   :  { %v518_v58 = vrot.slane %v517_v57, 2 }
 0x14a   :  { %v519_v59 = vadd.f32 %v518_v58, %v517_v57 }
 0x14c   :  { %v520_v60 = vrot.slane %v519_v59, 1 }
 0x14e   :  { %v521_v61 = vadd.f32 %v520_v60, %v519_v59 }
 0x150   :  { %616 = vpush %v521_v61 }
 0x155   :  { %v536_v62 = vpop.xlane.xlu0 %535 }
 0x156   :  { %v537_v63 = vrot.slane %v536_v62, 4 }
 0x158   :  { %v538_v0 = vadd.f32 %v537_v63, %v536_v62 }
 0x15a   :  { %v539_v1 = vrot.slane %v538_v0, 2 }
 0x15b   :  { %v557_v2 = vpop.xlane.xlu1 %556 }
 0x15c   :  { %v540_v3 = vadd.f32 %v539_v1, %v538_v0  ;;  %v558_v5 = vrot.slane %v557_v2, 4 }
 0x15e   :  { %v559_v4 = vadd.f32 %v558_v5, %v557_v2  ;;  %v541_v6 = vrot.slane %v540_v3, 1 }
 0x160   :  { %v560_v7 = vrot.slane %v559_v4, 2  ;;  %v542_v8 = vadd.f32 %v541_v6, %v540_v3 }
 0x162   :  { %v561_v9 = vadd.f32 %v560_v7, %v559_v4  ;;  %618 = vpush %v542_v8 }
 0x164   :  { %v562_v10 = vrot.slane %v561_v9, 1 }
 0x166   :  { %v563_v11 = vadd.f32 %v562_v10, %v561_v9 }
 0x168   :  { %620 = vpush %v563_v11 }
 0x181   :  { %s617_s0 = spop %616 }
 0x182   :  { %v523_v12 = vstv %s617_s0 }
 0x183   :  { %v566_v13 = vmul.f32 5.0, %v523_v12 }
 0x185   :  { %v567_v17 = vmul.f32 0.00048828125, %v566_v13 }
 0x193   :  { %s619_s2 = spop %618 }
 0x194   :  { %v544_v14 = vstv %s619_s2 }
 0x199   :  { %s621_s4 = spop %620 }
 0x19a   :  { %v565_v15 = vstv %s621_s4 }
 0x19b   :  { %v568_v16 = vadd.f32 %v565_v15, %v544_v14 }
 0x19d   :  { %v569_v18 = vmul.f32 0.125, %v568_v16 }
 0x19f   :  { %v570_v19 = vadd.f32 %v569_v18, %v567_v17 }
 0x1a1   :  { %572 = vst.msk [vmem:[#allocation6] sm:$0x1] %vm571_vm0, %v570_v19 }
 0x1a2   :  { %583 = dma.vmem_to_hbm [thread:$0]  %s579_s6, 16, %s581_s9, [#allocation5]  }
 0x1a3   :  { %700 = dma.done.wait [#allocation5], 16  }
 0x1a4   :  { %701 = vsyncadd [#allocation5], 4294967280 }
 0x1a5   :  { %588 = vsyncpa [#allocation4], 1 }
 0x1a6   :  { %589 = vsyncpa [#allocation5], 1 }

</bundles_post_ra>
